<compile_context>
chip_gen: v5e
topology: v5e:2x2
jax: 0.10.0
libtpu: 0.0.40
codegen_flags: <defaults>
</compile_context>

<pallas_src>
import jax
import jax.numpy as jnp
from jax.experimental import pallas as pl
from jax.experimental.pallas import tpu as pltpu


# ----------------------------- parameter packing -----------------------------

def _round_up(n, m):
    return ((n + m - 1) // m) * m


def _param_layout(in_layer, hidden_layer, encoder_layer, out_layer):
    """Row offsets of each tensor inside the packed (rows, lanes) parameter slab.

    Weights are stored TRANSPOSED ((out_features, in_features)) and biases as
    column vectors ((out_features, 1)) so the kernel's feature-on-sublane /
    batch-on-lane layout needs no in-kernel transposes.  Every tensor starts on
    an 8-row (sublane-tile) boundary so static slices never straddle a tile edge.
    """
    lanes = _round_up(max(in_layer, hidden_layer, encoder_layer, 1), 128)
    offs, r = {}, 0
    offs["w1t"] = r; r += _round_up(hidden_layer, 8)
    offs["b1"] = r;  r += _round_up(hidden_layer, 8)
    offs["w2t"] = r; r += _round_up(encoder_layer, 8)
    offs["b2"] = r;  r += _round_up(encoder_layer, 8)
    offs["wet"] = r; r += _round_up(encoder_layer, 8)
    offs["be"] = r;  r += _round_up(encoder_layer, 8)
    offs["w3t"] = r; r += _round_up(out_layer, 8)
    offs["b3"] = r;  r += _round_up(out_layer, 8)
    return offs, r, lanes


def pack_params(params, in_layer=1, hidden_layer=8, encoder_layer=8, out_layer=1):
    """Pack all weights/biases into one (rows, 128) f32 slab => single parameter DMA.

    Do this once at setup time (amortized), not per forward call.
    Expects params with weights stored (in_features, out_features) and biases (1, out).
    """
    offs, rows, lanes = _param_layout(in_layer, hidden_layer, encoder_layer, out_layer)
    slab = jnp.zeros((rows, lanes), jnp.float32)
    # Transposed weights: (out_features rows, in_features lanes); biases as columns.
    slab = slab.at[offs["w1t"]:offs["w1t"] + hidden_layer, :in_layer].set(params["w1"].T)
    slab = slab.at[offs["b1"]:offs["b1"] + hidden_layer, :1].set(params["b1"].T)
    slab = slab.at[offs["w2t"]:offs["w2t"] + encoder_layer, :hidden_layer].set(params["w2"].T)
    slab = slab.at[offs["b2"]:offs["b2"] + encoder_layer, :1].set(params["b2"].T)
    slab = slab.at[offs["wet"]:offs["wet"] + encoder_layer, :encoder_layer].set(params["we"].T)
    slab = slab.at[offs["be"]:offs["be"] + encoder_layer, :1].set(params["be"].T)
    slab = slab.at[offs["w3t"]:offs["w3t"] + out_layer, :encoder_layer].set(params["w3"].T)
    slab = slab.at[offs["b3"]:offs["b3"] + out_layer, :1].set(params["b3"].T)
    return slab


# --------------------------------- the kernel --------------------------------

def _sigmoid(z):
    # Single EUP tanh per element; no exp + full-precision divide chain.
    return 0.5 * (jnp.tanh(0.5 * z) + 1.0)


def _colwise_linear(h, w_t, b_col):
    """h:(K, TB) feature-major; w_t:(N, K); b_col:(N, 1) -> (N, TB).

    out[n, b] = sum_k w_t[n, k] * h[k, b] + b[n], done as unrolled broadcast-FMAs
    on the VPU (K, N <= 8, so the MXU's padded 128-wide push/pop is pure waste).
    Each term is one full-lane-width (N, TB) FMA.
    """
    acc = w_t[:, 0:1] * h[0:1, :]
    for k in range(1, h.shape[0]):
        acc = acc + w_t[:, k:k + 1] * h[k:k + 1, :]
    return acc + b_col


def _make_kernel(in_layer, hidden_layer, encoder_layer, out_layer, offs):
    ow1, ob1 = offs["w1t"], offs["b1"]
    ow2, ob2 = offs["w2t"], offs["b2"]
    owe, obe = offs["wet"], offs["be"]
    ow3, ob3 = offs["w3t"], offs["b3"]

    def kernel(x_ref, p_ref, o_ref):
        x = x_ref[...]                                                # (in, TB)

        # lin1 + sigmoid
        w1t = p_ref[ow1:ow1 + hidden_layer, 0:in_layer]               # (hid, in)
        b1c = p_ref[ob1:ob1 + hidden_layer, 0:1]                      # (hid, 1)
        h = _sigmoid(_colwise_linear(x, w1t, b1c))                    # (hid, TB)

        # lin2 + sigmoid
        w2t = p_ref[ow2:ow2 + encoder_layer, 0:hidden_layer]          # (enc, hid)
        b2c = p_ref[ob2:ob2 + encoder_layer, 0:1]
        h = _sigmoid(_colwise_linear(h, w2t, b2c))                    # (enc, TB)

        # encoder + sigmoid
        wet = p_ref[owe:owe + encoder_layer, 0:encoder_layer]         # (enc, enc)
        bec = p_ref[obe:obe + encoder_layer, 0:1]
        h = _sigmoid(_colwise_linear(h, wet, bec))                    # (enc, TB)

        # lin3 (no activation)
        w3t = p_ref[ow3:ow3 + out_layer, 0:encoder_layer]             # (out, enc)
        b3c = p_ref[ob3:ob3 + out_layer, 0:1]
        o_ref[...] = _colwise_linear(h, w3t, b3c).astype(o_ref.dtype)  # (out, TB)

    return kernel


# --------------------------------- the wrapper --------------------------------

def nnmodel_forward(x, param_slab, in_layer=1, hidden_layer=8, encoder_layer=8,
                    out_layer=1, batch_tile=8192):
    """x: (B, in_layer) f32; param_slab: output of pack_params(). Returns (B, out_layer)."""
    B = x.shape[0]
    offs, rows, lanes = _param_layout(in_layer, hidden_layer, encoder_layer, out_layer)
    assert param_slab.shape == (rows, lanes), "param_slab does not match layout"

    # Feature-major view: batch on the lane axis (layout plumbing only; for the
    # default in_layer=1 this is just a reshape).
    x_t = jnp.transpose(x)                                            # (in, B)

    # Lane tile over batch: full batch when small, 8192-column tiles (128-aligned,
    # double-buffered, tiny fraction of the v7x 64 MiB VMEM budget) when large.
    tb = B if B <= batch_tile else batch_tile
    grid = (pl.cdiv(B, tb),)

    kernel = _make_kernel(in_layer, hidden_layer, encoder_layer, out_layer, offs)

    out_t = pl.pallas_call(
        kernel,
        out_shape=jax.ShapeDtypeStruct((out_layer, B), x.dtype),
        grid=grid,
        in_specs=[
            pl.BlockSpec((in_layer, tb), lambda i: (0, i)),   # batch tile of x (lane axis)
            pl.BlockSpec((rows, lanes), lambda i: (0, 0)),    # whole param slab, 1 DMA
        ],
        out_specs=pl.BlockSpec((out_layer, tb), lambda i: (0, i)),
        compiler_params=pltpu.CompilerParams(
            dimension_semantics=("parallel",),                # megacore sharding on v7x
        ),
    )(x_t, param_slab)

    return jnp.transpose(out_t)                                       # (B, out)


# ------------------------------ init & reference ------------------------------

def init_params(key, in_layer=1, hidden_layer=8, encoder_layer=8, out_layer=1):
    """PyTorch-style init: U(-1/sqrt(fan_in), 1/sqrt(fan_in)); weights stored (in,out)."""
    ks = jax.random.split(key, 8)

    def lin(kw, kb, fan_in, fan_out):
        bound = 1.0 / jnp.sqrt(fan_in)
        w = jax.random.uniform(kw, (fan_in, fan_out), jnp.float32, -bound, bound)
        b = jax.random.uniform(kb, (1, fan_out), jnp.float32, -bound, bound)
        return w, b

    w1, b1 = lin(ks[0], ks[1], in_layer, hidden_layer)
    w2, b2 = lin(ks[2], ks[3], hidden_layer, encoder_layer)
    we, be = lin(ks[4], ks[5], encoder_layer, encoder_layer)
    w3, b3 = lin(ks[6], ks[7], encoder_layer, out_layer)
    return {"w1": w1, "b1": b1, "w2": w2, "b2": b2,
            "we": we, "be": be, "w3": w3, "b3": b3}


def reference_forward(x, p):
    sig = lambda z: 1.0 / (1.0 + jnp.exp(-z))
    h = sig(x @ p["w1"] + p["b1"])
    h = sig(h @ p["w2"] + p["b2"])
    h = sig(h @ p["we"] + p["be"])
    return h @ p["w3"] + p["b3"]


if __name__ == "__main__":
    key = jax.random.PRNGKey(0)
    k_x, k_p = jax.random.split(key)

    B, in_layer, hidden_layer, encoder_layer, out_layer = 8, 1, 8, 8, 1
    x = jax.random.normal(k_x, (B, in_layer), jnp.float32)
    params = init_params(k_p, in_layer, hidden_layer, encoder_layer, out_layer)
    slab = pack_params(params, in_layer, hidden_layer, encoder_layer, out_layer)

    out = nnmodel_forward(x, slab, in_layer, hidden_layer, encoder_layer, out_layer)
    out = jax.block_until_ready(out)

    ref = reference_forward(x, params)
    assert out.shape == (B, out_layer)
    assert jnp.allclose(out, ref, atol=1e-5, rtol=1e-5), (out, ref)

    print("KERNEL_OK")
</pallas_src>

<mosaic_0001>
module attributes {stable_mosaic.version = 11 : i64} {
  func.func @kernel(%arg0: i32, %arg1: memref<1x8xf32, #tpu.memory_space<vmem>>, %arg2: memref<64x128xf32, #tpu.memory_space<vmem>>, %arg3: memref<1x8xf32, #tpu.memory_space<vmem>>) attributes {dimension_semantics = [#tpu.dimension_semantics<parallel>], iteration_bounds = array<i64: 1>, scalar_prefetch = 0 : i64, scratch_operands = 0 : i64, tpu.core_type = #tpu.core_type<tc>, window_params = [{transform_indices = @transform_0, window_bounds = array<i64: 1, 8>}, {pipeline_mode = #tpu.pipeline_mode<synchronous>, transform_indices = @transform_1, window_bounds = array<i64: 64, 128>}, {transform_indices = @transform_2, window_bounds = array<i64: 1, 8>}]} {
    %c0 = arith.constant 0 : index
    %c0_0 = arith.constant 0 : index
    %0 = vector.load %arg1[%c0, %c0_0] : memref<1x8xf32, #tpu.memory_space<vmem>>, vector<1x8xf32>
    %c0_1 = arith.constant 0 : index
    %c0_2 = arith.constant 0 : index
    %1 = vector.load %arg2[%c0_1, %c0_2] : memref<64x128xf32, #tpu.memory_space<vmem>>, vector<8x1xf32>
    %c8 = arith.constant 8 : index
    %c0_3 = arith.constant 0 : index
    %2 = vector.load %arg2[%c8, %c0_3] : memref<64x128xf32, #tpu.memory_space<vmem>>, vector<8x1xf32>
    %3 = vector.broadcast %1 : vector<8x1xf32> to vector<8x8xf32>
    %4 = vector.broadcast %0 : vector<1x8xf32> to vector<8x8xf32>
    %5 = arith.mulf %3, %4 : vector<8x8xf32>
    %6 = vector.broadcast %2 : vector<8x1xf32> to vector<8x8xf32>
    %7 = arith.addf %5, %6 : vector<8x8xf32>
    %cst = arith.constant 5.000000e-01 : f32
    %8 = vector.broadcast %cst : f32 to vector<8x8xf32>
    %9 = arith.mulf %8, %7 : vector<8x8xf32>
    %10 = math.tanh %9 : vector<8x8xf32>
    %cst_4 = arith.constant 1.000000e+00 : f32
    %11 = vector.broadcast %cst_4 : f32 to vector<8x8xf32>
    %12 = arith.addf %10, %11 : vector<8x8xf32>
    %cst_5 = arith.constant 5.000000e-01 : f32
    %13 = vector.broadcast %cst_5 : f32 to vector<8x8xf32>
    %14 = arith.mulf %13, %12 : vector<8x8xf32>
    %c16 = arith.constant 16 : index
    %c0_6 = arith.constant 0 : index
    %15 = vector.load %arg2[%c16, %c0_6] : memref<64x128xf32, #tpu.memory_space<vmem>>, vector<8x8xf32>
    %c24 = arith.constant 24 : index
    %c0_7 = arith.constant 0 : index
    %16 = vector.load %arg2[%c24, %c0_7] : memref<64x128xf32, #tpu.memory_space<vmem>>, vector<8x1xf32>
    %17 = vector.extract_strided_slice %15 {offsets = [0, 0], sizes = [8, 1], strides = [1, 1]} : vector<8x8xf32> to vector<8x1xf32>
    %18 = vector.extract_strided_slice %14 {offsets = [0, 0], sizes = [1, 8], strides = [1, 1]} : vector<8x8xf32> to vector<1x8xf32>
    %19 = vector.broadcast %17 : vector<8x1xf32> to vector<8x8xf32>
    %20 = vector.broadcast %18 : vector<1x8xf32> to vector<8x8xf32>
    %21 = arith.mulf %19, %20 : vector<8x8xf32>
    %22 = vector.extract_strided_slice %15 {offsets = [0, 1], sizes = [8, 1], strides = [1, 1]} : vector<8x8xf32> to vector<8x1xf32>
    %23 = vector.extract_strided_slice %14 {offsets = [1, 0], sizes = [1, 8], strides = [1, 1]} : vector<8x8xf32> to vector<1x8xf32>
    %24 = vector.broadcast %22 : vector<8x1xf32> to vector<8x8xf32>
    %25 = vector.broadcast %23 : vector<1x8xf32> to vector<8x8xf32>
    %26 = arith.mulf %24, %25 : vector<8x8xf32>
    %27 = arith.addf %21, %26 : vector<8x8xf32>
    %28 = vector.extract_strided_slice %15 {offsets = [0, 2], sizes = [8, 1], strides = [1, 1]} : vector<8x8xf32> to vector<8x1xf32>
    %29 = vector.extract_strided_slice %14 {offsets = [2, 0], sizes = [1, 8], strides = [1, 1]} : vector<8x8xf32> to vector<1x8xf32>
    %30 = vector.broadcast %28 : vector<8x1xf32> to vector<8x8xf32>
    %31 = vector.broadcast %29 : vector<1x8xf32> to vector<8x8xf32>
    %32 = arith.mulf %30, %31 : vector<8x8xf32>
    %33 = arith.addf %27, %32 : vector<8x8xf32>
    %34 = vector.extract_strided_slice %15 {offsets = [0, 3], sizes = [8, 1], strides = [1, 1]} : vector<8x8xf32> to vector<8x1xf32>
    %35 = vector.extract_strided_slice %14 {offsets = [3, 0], sizes = [1, 8], strides = [1, 1]} : vector<8x8xf32> to vector<1x8xf32>
    %36 = vector.broadcast %34 : vector<8x1xf32> to vector<8x8xf32>
    %37 = vector.broadcast %35 : vector<1x8xf32> to vector<8x8xf32>
    %38 = arith.mulf %36, %37 : vector<8x8xf32>
    %39 = arith.addf %33, %38 : vector<8x8xf32>
    %40 = vector.extract_strided_slice %15 {offsets = [0, 4], sizes = [8, 1], strides = [1, 1]} : vector<8x8xf32> to vector<8x1xf32>
    %41 = vector.extract_strided_slice %14 {offsets = [4, 0], sizes = [1, 8], strides = [1, 1]} : vector<8x8xf32> to vector<1x8xf32>
    %42 = vector.broadcast %40 : vector<8x1xf32> to vector<8x8xf32>
    %43 = vector.broadcast %41 : vector<1x8xf32> to vector<8x8xf32>
    %44 = arith.mulf %42, %43 : vector<8x8xf32>
    %45 = arith.addf %39, %44 : vector<8x8xf32>
    %46 = vector.extract_strided_slice %15 {offsets = [0, 5], sizes = [8, 1], strides = [1, 1]} : vector<8x8xf32> to vector<8x1xf32>
    %47 = vector.extract_strided_slice %14 {offsets = [5, 0], sizes = [1, 8], strides = [1, 1]} : vector<8x8xf32> to vector<1x8xf32>
    %48 = vector.broadcast %46 : vector<8x1xf32> to vector<8x8xf32>
    %49 = vector.broadcast %47 : vector<1x8xf32> to vector<8x8xf32>
    %50 = arith.mulf %48, %49 : vector<8x8xf32>
    %51 = arith.addf %45, %50 : vector<8x8xf32>
    %52 = vector.extract_strided_slice %15 {offsets = [0, 6], sizes = [8, 1], strides = [1, 1]} : vector<8x8xf32> to vector<8x1xf32>
    %53 = vector.extract_strided_slice %14 {offsets = [6, 0], sizes = [1, 8], strides = [1, 1]} : vector<8x8xf32> to vector<1x8xf32>
    %54 = vector.broadcast %52 : vector<8x1xf32> to vector<8x8xf32>
    %55 = vector.broadcast %53 : vector<1x8xf32> to vector<8x8xf32>
    %56 = arith.mulf %54, %55 : vector<8x8xf32>
    %57 = arith.addf %51, %56 : vector<8x8xf32>
    %58 = vector.extract_strided_slice %15 {offsets = [0, 7], sizes = [8, 1], strides = [1, 1]} : vector<8x8xf32> to vector<8x1xf32>
    %59 = vector.extract_strided_slice %14 {offsets = [7, 0], sizes = [1, 8], strides = [1, 1]} : vector<8x8xf32> to vector<1x8xf32>
    %60 = vector.broadcast %58 : vector<8x1xf32> to vector<8x8xf32>
    %61 = vector.broadcast %59 : vector<1x8xf32> to vector<8x8xf32>
    %62 = arith.mulf %60, %61 : vector<8x8xf32>
    %63 = arith.addf %57, %62 : vector<8x8xf32>
    %64 = vector.broadcast %16 : vector<8x1xf32> to vector<8x8xf32>
    %65 = arith.addf %63, %64 : vector<8x8xf32>
    %cst_8 = arith.constant 5.000000e-01 : f32
    %66 = vector.broadcast %cst_8 : f32 to vector<8x8xf32>
    %67 = arith.mulf %66, %65 : vector<8x8xf32>
    %68 = math.tanh %67 : vector<8x8xf32>
    %cst_9 = arith.constant 1.000000e+00 : f32
    %69 = vector.broadcast %cst_9 : f32 to vector<8x8xf32>
    %70 = arith.addf %68, %69 : vector<8x8xf32>
    %cst_10 = arith.constant 5.000000e-01 : f32
    %71 = vector.broadcast %cst_10 : f32 to vector<8x8xf32>
    %72 = arith.mulf %71, %70 : vector<8x8xf32>
    %c32 = arith.constant 32 : index
    %c0_11 = arith.constant 0 : index
    %73 = vector.load %arg2[%c32, %c0_11] : memref<64x128xf32, #tpu.memory_space<vmem>>, vector<8x8xf32>
    %c40 = arith.constant 40 : index
    %c0_12 = arith.constant 0 : index
    %74 = vector.load %arg2[%c40, %c0_12] : memref<64x128xf32, #tpu.memory_space<vmem>>, vector<8x1xf32>
    %75 = vector.extract_strided_slice %73 {offsets = [0, 0], sizes = [8, 1], strides = [1, 1]} : vector<8x8xf32> to vector<8x1xf32>
    %76 = vector.extract_strided_slice %72 {offsets = [0, 0], sizes = [1, 8], strides = [1, 1]} : vector<8x8xf32> to vector<1x8xf32>
    %77 = vector.broadcast %75 : vector<8x1xf32> to vector<8x8xf32>
    %78 = vector.broadcast %76 : vector<1x8xf32> to vector<8x8xf32>
    %79 = arith.mulf %77, %78 : vector<8x8xf32>
    %80 = vector.extract_strided_slice %73 {offsets = [0, 1], sizes = [8, 1], strides = [1, 1]} : vector<8x8xf32> to vector<8x1xf32>
    %81 = vector.extract_strided_slice %72 {offsets = [1, 0], sizes = [1, 8], strides = [1, 1]} : vector<8x8xf32> to vector<1x8xf32>
    %82 = vector.broadcast %80 : vector<8x1xf32> to vector<8x8xf32>
    %83 = vector.broadcast %81 : vector<1x8xf32> to vector<8x8xf32>
    %84 = arith.mulf %82, %83 : vector<8x8xf32>
    %85 = arith.addf %79, %84 : vector<8x8xf32>
    %86 = vector.extract_strided_slice %73 {offsets = [0, 2], sizes = [8, 1], strides = [1, 1]} : vector<8x8xf32> to vector<8x1xf32>
    %87 = vector.extract_strided_slice %72 {offsets = [2, 0], sizes = [1, 8], strides = [1, 1]} : vector<8x8xf32> to vector<1x8xf32>
    %88 = vector.broadcast %86 : vector<8x1xf32> to vector<8x8xf32>
    %89 = vector.broadcast %87 : vector<1x8xf32> to vector<8x8xf32>
    %90 = arith.mulf %88, %89 : vector<8x8xf32>
    %91 = arith.addf %85, %90 : vector<8x8xf32>
    %92 = vector.extract_strided_slice %73 {offsets = [0, 3], sizes = [8, 1], strides = [1, 1]} : vector<8x8xf32> to vector<8x1xf32>
    %93 = vector.extract_strided_slice %72 {offsets = [3, 0], sizes = [1, 8], strides = [1, 1]} : vector<8x8xf32> to vector<1x8xf32>
    %94 = vector.broadcast %92 : vector<8x1xf32> to vector<8x8xf32>
    %95 = vector.broadcast %93 : vector<1x8xf32> to vector<8x8xf32>
    %96 = arith.mulf %94, %95 : vector<8x8xf32>
    %97 = arith.addf %91, %96 : vector<8x8xf32>
    %98 = vector.extract_strided_slice %73 {offsets = [0, 4], sizes = [8, 1], strides = [1, 1]} : vector<8x8xf32> to vector<8x1xf32>
    %99 = vector.extract_strided_slice %72 {offsets = [4, 0], sizes = [1, 8], strides = [1, 1]} : vector<8x8xf32> to vector<1x8xf32>
    %100 = vector.broadcast %98 : vector<8x1xf32> to vector<8x8xf32>
    %101 = vector.broadcast %99 : vector<1x8xf32> to vector<8x8xf32>
    %102 = arith.mulf %100, %101 : vector<8x8xf32>
    %103 = arith.addf %97, %102 : vector<8x8xf32>
    %104 = vector.extract_strided_slice %73 {offsets = [0, 5], sizes = [8, 1], strides = [1, 1]} : vector<8x8xf32> to vector<8x1xf32>
    %105 = vector.extract_strided_slice %72 {offsets = [5, 0], sizes = [1, 8], strides = [1, 1]} : vector<8x8xf32> to vector<1x8xf32>
    %106 = vector.broadcast %104 : vector<8x1xf32> to vector<8x8xf32>
    %107 = vector.broadcast %105 : vector<1x8xf32> to vector<8x8xf32>
    %108 = arith.mulf %106, %107 : vector<8x8xf32>
    %109 = arith.addf %103, %108 : vector<8x8xf32>
    %110 = vector.extract_strided_slice %73 {offsets = [0, 6], sizes = [8, 1], strides = [1, 1]} : vector<8x8xf32> to vector<8x1xf32>
    %111 = vector.extract_strided_slice %72 {offsets = [6, 0], sizes = [1, 8], strides = [1, 1]} : vector<8x8xf32> to vector<1x8xf32>
    %112 = vector.broadcast %110 : vector<8x1xf32> to vector<8x8xf32>
    %113 = vector.broadcast %111 : vector<1x8xf32> to vector<8x8xf32>
    %114 = arith.mulf %112, %113 : vector<8x8xf32>
    %115 = arith.addf %109, %114 : vector<8x8xf32>
    %116 = vector.extract_strided_slice %73 {offsets = [0, 7], sizes = [8, 1], strides = [1, 1]} : vector<8x8xf32> to vector<8x1xf32>
    %117 = vector.extract_strided_slice %72 {offsets = [7, 0], sizes = [1, 8], strides = [1, 1]} : vector<8x8xf32> to vector<1x8xf32>
    %118 = vector.broadcast %116 : vector<8x1xf32> to vector<8x8xf32>
    %119 = vector.broadcast %117 : vector<1x8xf32> to vector<8x8xf32>
    %120 = arith.mulf %118, %119 : vector<8x8xf32>
    %121 = arith.addf %115, %120 : vector<8x8xf32>
    %122 = vector.broadcast %74 : vector<8x1xf32> to vector<8x8xf32>
    %123 = arith.addf %121, %122 : vector<8x8xf32>
    %cst_13 = arith.constant 5.000000e-01 : f32
    %124 = vector.broadcast %cst_13 : f32 to vector<8x8xf32>
    %125 = arith.mulf %124, %123 : vector<8x8xf32>
    %126 = math.tanh %125 : vector<8x8xf32>
    %cst_14 = arith.constant 1.000000e+00 : f32
    %127 = vector.broadcast %cst_14 : f32 to vector<8x8xf32>
    %128 = arith.addf %126, %127 : vector<8x8xf32>
    %cst_15 = arith.constant 5.000000e-01 : f32
    %129 = vector.broadcast %cst_15 : f32 to vector<8x8xf32>
    %130 = arith.mulf %129, %128 : vector<8x8xf32>
    %c48 = arith.constant 48 : index
    %c0_16 = arith.constant 0 : index
    %131 = vector.load %arg2[%c48, %c0_16] : memref<64x128xf32, #tpu.memory_space<vmem>>, vector<1x8xf32>
    %c56 = arith.constant 56 : index
    %c0_17 = arith.constant 0 : index
    %132 = vector.load %arg2[%c56, %c0_17] : memref<64x128xf32, #tpu.memory_space<vmem>>, vector<1x1xf32>
    %133 = vector.extract_strided_slice %131 {offsets = [0, 0], sizes = [1, 1], strides = [1, 1]} : vector<1x8xf32> to vector<1x1xf32>
    %134 = vector.extract_strided_slice %130 {offsets = [0, 0], sizes = [1, 8], strides = [1, 1]} : vector<8x8xf32> to vector<1x8xf32>
    %135 = vector.broadcast %133 : vector<1x1xf32> to vector<1x8xf32>
    %136 = arith.mulf %135, %134 : vector<1x8xf32>
    %137 = vector.extract_strided_slice %131 {offsets = [0, 1], sizes = [1, 1], strides = [1, 1]} : vector<1x8xf32> to vector<1x1xf32>
    %138 = vector.extract_strided_slice %130 {offsets = [1, 0], sizes = [1, 8], strides = [1, 1]} : vector<8x8xf32> to vector<1x8xf32>
    %139 = vector.broadcast %137 : vector<1x1xf32> to vector<1x8xf32>
    %140 = arith.mulf %139, %138 : vector<1x8xf32>
    %141 = arith.addf %136, %140 : vector<1x8xf32>
    %142 = vector.extract_strided_slice %131 {offsets = [0, 2], sizes = [1, 1], strides = [1, 1]} : vector<1x8xf32> to vector<1x1xf32>
    %143 = vector.extract_strided_slice %130 {offsets = [2, 0], sizes = [1, 8], strides = [1, 1]} : vector<8x8xf32> to vector<1x8xf32>
    %144 = vector.broadcast %142 : vector<1x1xf32> to vector<1x8xf32>
    %145 = arith.mulf %144, %143 : vector<1x8xf32>
    %146 = arith.addf %141, %145 : vector<1x8xf32>
    %147 = vector.extract_strided_slice %131 {offsets = [0, 3], sizes = [1, 1], strides = [1, 1]} : vector<1x8xf32> to vector<1x1xf32>
    %148 = vector.extract_strided_slice %130 {offsets = [3, 0], sizes = [1, 8], strides = [1, 1]} : vector<8x8xf32> to vector<1x8xf32>
    %149 = vector.broadcast %147 : vector<1x1xf32> to vector<1x8xf32>
    %150 = arith.mulf %149, %148 : vector<1x8xf32>
    %151 = arith.addf %146, %150 : vector<1x8xf32>
    %152 = vector.extract_strided_slice %131 {offsets = [0, 4], sizes = [1, 1], strides = [1, 1]} : vector<1x8xf32> to vector<1x1xf32>
    %153 = vector.extract_strided_slice %130 {offsets = [4, 0], sizes = [1, 8], strides = [1, 1]} : vector<8x8xf32> to vector<1x8xf32>
    %154 = vector.broadcast %152 : vector<1x1xf32> to vector<1x8xf32>
    %155 = arith.mulf %154, %153 : vector<1x8xf32>
    %156 = arith.addf %151, %155 : vector<1x8xf32>
    %157 = vector.extract_strided_slice %131 {offsets = [0, 5], sizes = [1, 1], strides = [1, 1]} : vector<1x8xf32> to vector<1x1xf32>
    %158 = vector.extract_strided_slice %130 {offsets = [5, 0], sizes = [1, 8], strides = [1, 1]} : vector<8x8xf32> to vector<1x8xf32>
    %159 = vector.broadcast %157 : vector<1x1xf32> to vector<1x8xf32>
    %160 = arith.mulf %159, %158 : vector<1x8xf32>
    %161 = arith.addf %156, %160 : vector<1x8xf32>
    %162 = vector.extract_strided_slice %131 {offsets = [0, 6], sizes = [1, 1], strides = [1, 1]} : vector<1x8xf32> to vector<1x1xf32>
    %163 = vector.extract_strided_slice %130 {offsets = [6, 0], sizes = [1, 8], strides = [1, 1]} : vector<8x8xf32> to vector<1x8xf32>
    %164 = vector.broadcast %162 : vector<1x1xf32> to vector<1x8xf32>
    %165 = arith.mulf %164, %163 : vector<1x8xf32>
    %166 = arith.addf %161, %165 : vector<1x8xf32>
    %167 = vector.extract_strided_slice %131 {offsets = [0, 7], sizes = [1, 1], strides = [1, 1]} : vector<1x8xf32> to vector<1x1xf32>
    %168 = vector.extract_strided_slice %130 {offsets = [7, 0], sizes = [1, 8], strides = [1, 1]} : vector<8x8xf32> to vector<1x8xf32>
    %169 = vector.broadcast %167 : vector<1x1xf32> to vector<1x8xf32>
    %170 = arith.mulf %169, %168 : vector<1x8xf32>
    %171 = arith.addf %166, %170 : vector<1x8xf32>
    %172 = vector.broadcast %132 : vector<1x1xf32> to vector<1x8xf32>
    %173 = arith.addf %171, %172 : vector<1x8xf32>
    %c0_18 = arith.constant 0 : index
    %c0_19 = arith.constant 0 : index
    %174 = vector.load %arg3[%c0_18, %c0_19] : memref<1x8xf32, #tpu.memory_space<vmem>>, vector<1x8xf32>
    tpu.vector_store %arg3[%c0_18, %c0_19], %173 {strides = array<i32>} : memref<1x8xf32, #tpu.memory_space<vmem>>, vector<1x8xf32>,
    return
  }
  func.func @transform_0(%arg0: i32) -> (i32, i32) {
    %c0_i32 = arith.constant 0 : i32
    %c0_i32_0 = arith.constant 0 : i32
    return %c0_i32, %arg0 : i32, i32
  }
  func.func @transform_1(%arg0: i32) -> (i32, i32) {
    %c0_i32 = arith.constant 0 : i32
    %c0_i32_0 = arith.constant 0 : i32
    %c0_i32_1 = arith.constant 0 : i32
    return %c0_i32, %c0_i32_0 : i32, i32
  }
  func.func @transform_2(%arg0: i32) -> (i32, i32) {
    %c0_i32 = arith.constant 0 : i32
    %c0_i32_0 = arith.constant 0 : i32
    return %c0_i32, %arg0 : i32, i32
  }
}

</mosaic_0001>

<bundles_post_ra>
// kernel: tpu_custom_call.1
= control target key start
LH: loop header
LB: loop body
LE: loop exit
PB: predicated region body
PF: predicated region fallthrough
CT: control target
= control target key end

     0   :  { %7 = vsyncpa [#allocation3], 0  ;;  %s463_s0 = inlined_call_operand.hbm [shape: f32[1,8], index: 0, kind: input, shape index: {}]   ;;  %s464_s1 = inlined_call_operand.hbm [shape: f32[64,128], index: 1, kind: input, shape index: {}]   ;;  %s465_s2 = inlined_call_operand.hbm [shape: f32[1,8], index: 2, kind: output, shape index: {}]  }
   0x1   :  { %8 = vsyncpa [#allocation6], 0 }
   0x2   :  { %9 = vsyncpa [#allocation4], 0  ;;  %s15_s11 = sshll.u32 %s463_s0, 4  ;;  %s418_s12 = smov [#allocation2]   ;;  %s16_s11 = int_to_ptr.hbm [resolvable:$true] %s15_s11 }
   0x3   :  { %s17_s13 = sshll.u32 %s418_s12, 4  ;;  %s25_s16 = sshll.u32 %s464_s1, 4  ;;  %s18_s13 = int_to_ptr.vmem [resolvable:$true] %s17_s13  ;;  %s26_s16 = int_to_ptr.hbm [resolvable:$true] %s25_s16 }
   0x4   :  { %20 = dma.hbm_to_vmem [thread:$0]  %s16_s11, 16, %s18_s13, [#allocation3]  }
   0x5   :  { %s419_s17 = smov [#allocation5]   ;;  %s420_s19 = smov 128  }
   0x6   :  { %s27_s18 = sshll.u32 %s419_s17, 4  ;;  %s421_s20 = smov 8   ;;  %s28_s18 = int_to_ptr.vmem [resolvable:$true] %s27_s18 }
   0x7   :  { %33 = dma.hbm_to_vmem [thread:$0]  %s26_s16, 1024, %s28_s18, [#allocation6], %s420_s19, %s420_s19, %s421_s20  }
   0x8   :  { %412 = dma.done.wait [#allocation3], 16  }
   0x9   :  { %413 = vsyncadd [#allocation3], 4294967280 }
   0xa   :  { %414 = dma.done.wait [#allocation6], 1024  }
   0xb   :  { %415 = vsyncadd [#allocation6], 4294966272  ;;  %v422_v0 = vmov 0   ;;  %v423_v1 = vmov 2   ;;  %v64_v2 = vld [vmem:[#allocation5 + $0x10] sm:$0xff]  ;;  %v43_v3 = vld [vmem:[#allocation5] sm:$0xff] }
   0xc   :  { %305 = vset.pattern.permute.xlu1 %v422_v0  ;;  %304 = vset.pattern.permute.xlu0 %v422_v0  ;;  %v44_v4 = vld [vmem:[#allocation5 + $0x8] sm:$0xff]  ;;  %v424_v5 = vmov 1   ;;  %v425_v6 = vmov 3   ;;  %v426_v7 = vmov 4   ;;  %v427_v8 = vmov 5   ;;  %v132_v10 = vld [vmem:[#allocation5 + $0x20] sm:$0xff] }
   0xd   :  { %307 = vset.pattern.permute.xlu2 %v423_v1  ;;  %68 = vperm.xlu1 %305, %v64_v2   ;;  %v428_v9 = vmov 6   ;;  %v65_v11 = vld [vmem:[#allocation5 + $0x18] sm:$0xff]  ;;  %v429_v12 = vmov 7   ;;  %v200_v13 = vld [vmem:[#allocation5 + $0x30] sm:$0x1]  ;;  %v133_v14 = vld [vmem:[#allocation5 + $0x28] sm:$0xff] }
   0xe   :  { %47 = vperm.xlu0 %304, %v43_v3   ;;  %81 = vperm.xlu2 %307, %v64_v2   ;;  %v201_v15 = vld [vmem:[#allocation5 + $0x38] sm:$0x1]  ;;  %v333_v17 = vld [vmem:[#allocation2] ss:$0 sm:$0xff]  ;;  %s430_s0 = smov [#allocation7]   ;;  %s280_s23 = sshll.u32 %s465_s2, 4  ;;  %s281_s23 = int_to_ptr.hbm [resolvable:$true] %s280_s23 }
   0xf   :  { %s278_s1 = sshll.u32 %s430_s0, 4  ;;  %vm271_vm0 = vcmask 57344   ;;  %s279_s1 = int_to_ptr.vmem [resolvable:$true] %s278_s1 }
  0x15   :  { %306 = vset.pattern.permute.xlu1 %v424_v5 }
  0x16   :  { %56 = vperm.xlu0 %304, %v44_v4   ;;  %74 = vperm.xlu1 %306, %v64_v2  }
  0x17   :  { %308 = vset.pattern.permute.xlu2 %v425_v6 }
  0x18   :  { %88 = vperm.xlu2 %308, %v64_v2  }
  0x1e   :  { %309 = vset.pattern.permute.xlu0 %v426_v7  ;;  %310 = vset.pattern.permute.xlu1 %v427_v8 }
  0x1f   :  { %95 = vperm.xlu0 %309, %v64_v2   ;;  %102 = vperm.xlu1 %310, %v64_v2  }
  0x20   :  { %311 = vset.pattern.permute.xlu2 %v428_v9 }
  0x21   :  { %109 = vperm.xlu2 %311, %v64_v2  }
  0x27   :  { %314 = vset.pattern.permute.xlu0 %v422_v0  ;;  %312 = vset.pattern.permute.xlu1 %v429_v12 }
  0x28   :  { %136 = vperm.xlu0 %314, %v132_v10   ;;  %116 = vperm.xlu1 %312, %v64_v2  }
  0x29   :  { %313 = vset.pattern.permute.xlu2 %v422_v0 }
  0x2a   :  { %124 = vperm.xlu2 %313, %v65_v11  }
  0x30   :  { %319 = vset.pattern.permute.xlu0 %v427_v8  ;;  %315 = vset.pattern.permute.xlu1 %v424_v5 }
  0x31   :  { %170 = vperm.xlu0 %319, %v132_v10   ;;  %142 = vperm.xlu1 %315, %v132_v10  }
  0x32   :  { %316 = vset.pattern.permute.xlu2 %v423_v1 }
  0x33   :  { %149 = vperm.xlu2 %316, %v132_v10  }
  0x39   :  { %324 = vset.pattern.permute.xlu0 %v424_v5  ;;  %317 = vset.pattern.permute.xlu1 %v425_v6 }
  0x3a   :  { %209 = vperm.xlu0 %324, %v200_v13   ;;  %156 = vperm.xlu1 %317, %v132_v10  }
  0x3b   :  { %318 = vset.pattern.permute.xlu2 %v426_v7 }
  0x3c   :  { %163 = vperm.xlu2 %318, %v132_v10  }
  0x42   :  { %329 = vset.pattern.permute.xlu0 %v428_v9  ;;  %320 = vset.pattern.permute.xlu1 %v428_v9 }
  0x43   :  { %250 = vperm.xlu0 %329, %v200_v13   ;;  %177 = vperm.xlu1 %320, %v132_v10  }
  0x44   :  { %321 = vset.pattern.permute.xlu2 %v429_v12 }
  0x45   :  { %184 = vperm.xlu2 %321, %v132_v10  }
  0x4b   :  { %332 = vset.pattern.permute.xlu0 %v422_v0  ;;  %322 = vset.pattern.permute.xlu1 %v422_v0 }
  0x4c   :  { %192 = vperm.xlu1 %322, %v133_v14  }
  0x4d   :  { %323 = vset.pattern.permute.xlu2 %v422_v0 }
  0x4e   :  { %204 = vperm.xlu2 %323, %v200_v13  }
  0x54   :  { %325 = vset.pattern.permute.xlu1 %v423_v1 }
  0x55   :  { %218 = vperm.xlu1 %325, %v200_v13  }
  0x56   :  { %326 = vset.pattern.permute.xlu2 %v425_v6 }
  0x57   :  { %226 = vperm.xlu2 %326, %v200_v13  }
  0x5d   :  { %327 = vset.pattern.permute.xlu1 %v426_v7 }
  0x5e   :  { %234 = vperm.xlu1 %327, %v200_v13  }
  0x5f   :  { %328 = vset.pattern.permute.xlu2 %v427_v8 }
  0x60   :  { %242 = vperm.xlu2 %328, %v200_v13  }
  0x66   :  { %330 = vset.pattern.permute.xlu1 %v429_v12 }
  0x67   :  { %258 = vperm.xlu1 %330, %v200_v13  }
  0x68   :  { %331 = vset.pattern.permute.xlu2 %v422_v0  ;;  %v82_v22 = vpop.permute.xlu2 %81 }
  0x69   :  { %267 = vperm.xlu2 %331, %v201_v15  }
  0x72   :  { %v89_v26 = vpop.permute.xlu2 %88 }
  0x7b   :  { %v110_v39 = vpop.permute.xlu2 %109 }
  0x7f   :  { %v69_v18 = vpop.permute.xlu1 %68 }
  0x80   :  { %v48_v16 = vpop.permute.xlu0 %47 }
  0x81   :  { %v53_v19 = vmul.f32 %v333_v17, %v48_v16 }
  0x84   :  { %v125_v55 = vpop.permute.xlu2 %124 }
  0x88   :  { %v57_v20 = vpop.permute.xlu0 %56  ;;  %v75_v24 = vpop.permute.xlu1 %74 }
  0x89   :  { %v59_v21 = vadd.f32 %v57_v20, %v53_v19 }
  0x8b   :  { %v60_v23 = vmul.f32 0.5, %v59_v21 }
  0x8d   :  { %334 = vtanh.f32 %v60_v23  ;;  %v150_v60 = vpop.permute.xlu2 %149 }
  0x91   :  { %v103_v32 = vpop.permute.xlu1 %102  ;;  %v96_v40 = vpop.permute.xlu0 %95 }
  0x93   :  { %v335_v25 = vpop.eup %334 }
  0x94   :  { %v62_v27 = vadd.f32 1.0, %v335_v25 }
  0x96   :  { %v63_v28 = vmul.f32 0.5, %v62_v27  ;;  %v164_v6 = vpop.permute.xlu2 %163 }
  0x98   :  { %v84_v29 = vperm.slane %v63_v28, 2  ;;  %v71_v30 = vperm.slane %v63_v28, 0  ;;  %v77_v31 = vperm.slane %v63_v28, 1  ;;  %v91_v35 = vperm.slane %v63_v28, 3 }
  0x99   :  { %v98_v38 = vperm.slane %v63_v28, 4  ;;  %v105_v43 = vperm.slane %v63_v28, 5  ;;  %v112_v45 = vperm.slane %v63_v28, 6  ;;  %v119_v52 = vperm.slane %v63_v28, 7 }
  0x9a   :  { %v72_v33 = vmul.f32 %v71_v30, %v69_v18  ;;  %v78_v34 = vmul.f32 %v77_v31, %v75_v24  ;;  %v85_v36 = vmul.f32 %v84_v29, %v82_v22  ;;  %v92_v42 = vmul.f32 %v91_v35, %v89_v26  ;;  %v117_v49 = vpop.permute.xlu1 %116  ;;  %v137_v1 = vpop.permute.xlu0 %136 }
  0x9b   :  { %v99_v46 = vmul.f32 %v98_v38, %v96_v40  ;;  %v106_v47 = vmul.f32 %v105_v43, %v103_v32  ;;  %v113_v50 = vmul.f32 %v112_v45, %v110_v39  ;;  %v120_v53 = vmul.f32 %v119_v52, %v117_v49 }
  0x9c   :  { %v79_v37 = vadd.f32 %v78_v34, %v72_v33 }
  0x9e   :  { %v86_v41 = vadd.f32 %v85_v36, %v79_v37 }
  0x9f   :  { %v185_v23 = vpop.permute.xlu2 %184 }
  0xa0   :  { %v93_v44 = vadd.f32 %v92_v42, %v86_v41 }
  0xa2   :  { %v100_v48 = vadd.f32 %v99_v46, %v93_v44 }
  0xa3   :  { %v143_v58 = vpop.permute.xlu1 %142  ;;  %v171_v16 = vpop.permute.xlu0 %170 }
  0xa4   :  { %v107_v51 = vadd.f32 %v106_v47, %v100_v48 }
  0xa6   :  { %v114_v54 = vadd.f32 %v113_v50, %v107_v51 }
  0xa8   :  { %v121_v56 = vadd.f32 %v120_v53, %v114_v54  ;;  %v205_v32 = vpop.permute.xlu2 %204 }
  0xaa   :  { %v127_v57 = vadd.f32 %v125_v55, %v121_v56 }
  0xac   :  { %v128_v59 = vmul.f32 0.5, %v127_v57  ;;  %v157_v63 = vpop.permute.xlu1 %156  ;;  %v210_v38 = vpop.permute.xlu0 %209 }
  0xae   :  { %336 = vtanh.f32 %v128_v59 }
  0xb1   :  { %v227_v37 = vpop.permute.xlu2 %226 }
  0xb4   :  { %v337_v61 = vpop.eup %336 }
  0xb5   :  { %v130_v62 = vadd.f32 1.0, %v337_v61  ;;  %v178_v12 = vpop.permute.xlu1 %177  ;;  %v251_v55 = vpop.permute.xlu0 %250 }
  0xb7   :  { %v131_v0 = vmul.f32 0.5, %v130_v62 }
  0xb9   :  { %v145_v2 = vperm.slane %v131_v0, 1  ;;  %v152_v3 = vperm.slane %v131_v0, 2  ;;  %v139_v4 = vperm.slane %v131_v0, 0  ;;  %v159_v7 = vperm.slane %v131_v0, 3 }
  0xba   :  { %v166_v10 = vperm.slane %v131_v0, 4  ;;  %v173_v15 = vperm.slane %v131_v0, 5  ;;  %v180_v18 = vperm.slane %v131_v0, 6  ;;  %v187_v20 = vperm.slane %v131_v0, 7  ;;  %v243_v51 = vpop.permute.xlu2 %242 }
  0xbb   :  { %v146_v5 = vmul.f32 %v145_v2, %v143_v58  ;;  %v140_v8 = vmul.f32 %v139_v4, %v137_v1  ;;  %v153_v9 = vmul.f32 %v152_v3, %v150_v60  ;;  %v160_v13 = vmul.f32 %v159_v7, %v157_v63 }
  0xbc   :  { %v167_v17 = vmul.f32 %v166_v10, %v164_v6  ;;  %v174_v22 = vmul.f32 %v173_v15, %v171_v16  ;;  %v181_v24 = vmul.f32 %v180_v18, %v178_v12  ;;  %v188_v26 = vmul.f32 %v187_v20, %v185_v23 }
  0xbd   :  { %v147_v11 = vadd.f32 %v146_v5, %v140_v8 }
  0xbe   :  { %v193_v28 = vpop.permute.xlu1 %192 }
  0xbf   :  { %v154_v14 = vadd.f32 %v153_v9, %v147_v11 }
  0xc1   :  { %v161_v19 = vadd.f32 %v160_v13, %v154_v14 }
  0xc3   :  { %v168_v21 = vadd.f32 %v167_v17, %v161_v19  ;;  %v268_v0 = vpop.permute.xlu2 %267 }
  0xc5   :  { %v175_v25 = vadd.f32 %v174_v22, %v168_v21 }
  0xc7   :  { %v182_v27 = vadd.f32 %v181_v24, %v175_v25  ;;  %v219_v33 = vpop.permute.xlu1 %218 }
  0xc9   :  { %v189_v29 = vadd.f32 %v188_v26, %v182_v27 }
  0xcb   :  { %v195_v30 = vadd.f32 %v193_v28, %v189_v29 }
  0xcd   :  { %v196_v31 = vmul.f32 0.5, %v195_v30 }
  0xcf   :  { %338 = vtanh.f32 %v196_v31 }
  0xd0   :  { %v235_v41 = vpop.permute.xlu1 %234 }
  0xd5   :  { %v339_v34 = vpop.eup %338 }
  0xd6   :  { %v198_v35 = vadd.f32 1.0, %v339_v34 }
  0xd8   :  { %v199_v36 = vmul.f32 0.5, %v198_v35 }
  0xd9   :  { %v259_v59 = vpop.permute.xlu1 %258 }
  0xda   :  { %v221_v39 = vrot.slane %v199_v36, 2  ;;  %v213_v40 = vrot.slane %v199_v36, 1  ;;  %v207_v42 = vmul.f32 %v205_v32, %v199_v36  ;;  %v229_v43 = vrot.slane %v199_v36, 3 }
  0xdb   :  { %v237_v46 = vrot.slane %v199_v36, 4  ;;  %v245_v50 = vrot.slane %v199_v36, 5  ;;  %v253_v54 = vrot.slane %v199_v36, 6  ;;  %v261_v58 = vrot.slane %v199_v36, 7 }
  0xdc   :  { %v215_v44 = vmul.f32 %v213_v40, %v210_v38  ;;  %v223_v45 = vmul.f32 %v221_v39, %v219_v33  ;;  %v231_v48 = vmul.f32 %v229_v43, %v227_v37 }
  0xdd   :  { %v239_v52 = vmul.f32 %v237_v46, %v235_v41  ;;  %v247_v57 = vmul.f32 %v245_v50, %v243_v51  ;;  %v255_v61 = vmul.f32 %v253_v54, %v251_v55  ;;  %v263_v62 = vmul.f32 %v261_v58, %v259_v59 }
  0xde   :  { %v216_v47 = vadd.f32 %v215_v44, %v207_v42 }
  0xe0   :  { %v224_v49 = vadd.f32 %v223_v45, %v216_v47 }
  0xe2   :  { %v232_v53 = vadd.f32 %v231_v48, %v224_v49 }
  0xe4   :  { %v240_v56 = vadd.f32 %v239_v52, %v232_v53 }
  0xe6   :  { %v248_v60 = vadd.f32 %v247_v57, %v240_v56 }
  0xe8   :  { %v256_v63 = vadd.f32 %v255_v61, %v248_v60 }
  0xea   :  { %v264_v1 = vadd.f32 %v263_v62, %v256_v63 }
  0xec   :  { %v270_v2 = vadd.f32 %v268_v0, %v264_v1 }
  0xee   :  { %272 = vst.msk [vmem:[#allocation7] sm:$0x1] %vm271_vm0, %v270_v2 }
  0xef   :  { %283 = dma.vmem_to_hbm [thread:$0]  %s279_s1, 16, %s281_s23, [#allocation4]  }
  0xf0   :  { %416 = dma.done.wait [#allocation4], 16  }
  0xf1   :  { %417 = vsyncadd [#allocation4], 4294967280 }
  0xf2   :  { %288 = vsyncpa [#allocation3], 1 }
  0xf3   :  { %289 = vsyncpa [#allocation6], 1 }
  0xf4   :  { %290 = vsyncpa [#allocation4], 1 }

</bundles_post_ra>
